<compile_context>
chip_gen: v6e
topology: v6e:2x2x1
jax: 0.10.0
libtpu: 0.0.40
codegen_flags: <defaults>
</compile_context>

<pallas_src>
import functools

import jax
import jax.numpy as jnp
from jax.experimental import pallas as pl
from jax.experimental.pallas import tpu as pltpu

LANE = 128
SUBLANE = 8


def _round_up(x, m):
    return (x + m - 1) // m * m


def _round_down(x, m):
    return (x // m) * m


def _cdiv(a, b):
    return (a + b - 1) // b


def _vmem_capacity_bytes():
    try:
        info = pltpu.get_tpu_info()
        cap = getattr(info, "vmem_capacity_bytes", None)
        if cap:
            return int(cap)
    except Exception:
        pass
    return 64 << 20  # conservative default: v7x has the smallest VMEM


_VMEM_CAP = _vmem_capacity_bytes()
_BIG_VMEM = _VMEM_CAP >= (96 << 20)           # v5e / v6e: 128 MiB physical

# Per-x-slab budget for the fused path (in+out double-buffered => ~4x this).
_FUSED_X_BLOCK_BYTE_BUDGET = (22 << 20) if _BIG_VMEM else (6 << 20)
# Hard ceiling ever requested from Mosaic.
_VMEM_LIMIT_CAP = (108 << 20) if _BIG_VMEM else (56 << 20)


def _vmem_limit(bytes_needed):
    return int(min(max(int(bytes_needed) + (8 << 20), 32 << 20), _VMEM_LIMIT_CAP))


# ----------------------------------------------------------------------------
# Fused single-pass kernel: pool + gate + scale on one (bt, C, HW) block.
# ----------------------------------------------------------------------------
def _fe_fused_kernel(x_ref, wt_ref, o_ref, *, inv_hw):
    # x_ref: (bt, C, HW)   wt_ref: (C, C) == W^T   o_ref: (bt, C, HW)
    x = x_ref[...]                                              # native dtype
    # Global average pool (f32 accumulation); divide by the TRUE H*W.
    pooled = jnp.sum(x, axis=-1, dtype=jnp.float32) * inv_hw    # (bt, C) f32
    # nn.Linear(C, C, bias=False): y = pooled @ W^T.  Cast the tiny pooled
    # vector to the weight dtype (not the weight to f32) -> native MXU path.
    wt = wt_ref[...]
    y = jnp.dot(pooled.astype(wt.dtype), wt,
                preferred_element_type=jnp.float32)             # (bt, C) f32
    gate = jax.nn.sigmoid(y).astype(x.dtype)                    # (bt, C)
    o_ref[...] = (x * gate[:, :, None]).astype(o_ref.dtype)


# ----------------------------------------------------------------------------
# Two-phase fallback.
#   Phase A: pooled sums over spatial tiles (tail-masked, weight-free kernel).
#   (gate = sigmoid(mean @ W^T) is computed in plain XLA between the calls.)
#   Phase B: lane-dense streaming channel scale.
# ----------------------------------------------------------------------------
def _fe_pool_kernel(x_ref, sum_ref, *, hw):
    # x_ref: (1, C, hw_tile)   sum_ref: (1, C, 1) f32 (resident accumulator)
    t = pl.program_id(1)

    @pl.when(t == 0)
    def _():
        sum_ref[...] = jnp.zeros_like(sum_ref)

    x = x_ref[...]
    hw_tile = x.shape[-1]
    valid = hw - t * hw_tile                     # lanes still in-bounds (traced)
    lane = jax.lax.broadcasted_iota(jnp.int32, x.shape, dimension=2)
    xz = jnp.where(lane < valid, x, jnp.zeros_like(x))
    sum_ref[...] += jnp.sum(xz, axis=-1, keepdims=True, dtype=jnp.float32)


def _fe_scale_kernel(x_ref, g_ref, o_ref):
    # x_ref: (1, C, hw_tile)  g_ref: (1, C, 1) f32  o_ref: (1, C, hw_tile)
    x = x_ref[...]
    o_ref[...] = (x * g_ref[...].astype(x.dtype)).astype(o_ref.dtype)


# ----------------------------------------------------------------------------
# Wrapper
# ----------------------------------------------------------------------------
def feature_enhancement(x, w, *, force_two_phase=False):
    """x: (B, C, H, W); w: (C, C) weight of nn.Linear(C, C, bias=False)."""
    B, C, H, W = x.shape
    HW = H * W
    inv_hw = 1.0 / float(HW)
    dt_size = jnp.dtype(x.dtype).itemsize
    w_bytes = C * C * jnp.dtype(w.dtype).itemsize
    C_pad = _round_up(C, SUBLANE)

    # Pre-transpose the weight once in the wrapper (never per grid step).
    wt = w.T                                                     # (C, C)

    x_flat = x.reshape(B, C, HW)                 # no padding, no copies

    per_item_bytes = C_pad * _round_up(HW, LANE) * dt_size
    use_fused = (not force_two_phase) and per_item_bytes <= _FUSED_X_BLOCK_BYTE_BUDGET

    if use_fused:
        # Fold batch items per block to amortize per-step overhead; ragged
        # last block is fine (rows are independent, tail writes are masked).
        max_bt = max(1, _FUSED_X_BLOCK_BYTE_BUDGET // per_item_bytes)
        bt = min(B, max_bt)
        if B >= 2:
            # Keep >= 2 grid steps so dual-TC chips (v7x) use both cores.
            bt = min(bt, _cdiv(B, 2))
        grid = (_cdiv(B, bt),)
        block_bytes = bt * per_item_bytes

        cost = pl.CostEstimate(
            flops=int(2 * B * C * HW + 2 * B * C * C),
            transcendentals=int(B * C),
            bytes_accessed=int(2 * B * C * HW * dt_size + w_bytes),
        )

        out_flat = pl.pallas_call(
            functools.partial(_fe_fused_kernel, inv_hw=inv_hw),
            out_shape=jax.ShapeDtypeStruct((B, C, HW), x.dtype),
            grid_spec=pltpu.PrefetchScalarGridSpec(
                num_scalar_prefetch=0,
                grid=grid,
                in_specs=[
                    pl.BlockSpec((bt, C, HW), lambda b: (b, 0, 0)),
                    pl.BlockSpec((C, C), lambda b: (0, 0)),
                ],
                out_specs=pl.BlockSpec((bt, C, HW), lambda b: (b, 0, 0)),
            ),
            compiler_params=pltpu.CompilerParams(
                dimension_semantics=("parallel",),
                vmem_limit_bytes=_vmem_limit(4 * block_bytes + 2 * w_bytes),
            ),
            cost_estimate=cost,
        )(x_flat, wt)
        return out_flat.reshape(B, C, H, W)

    # ----------------------- two-phase fallback path -----------------------
    # Spatial tile derived from the per-generation VMEM budget (Phase B is the
    # tightest: in + out double-buffered = 4x tile).
    scale_budget = max(_VMEM_LIMIT_CAP - (12 << 20), 16 << 20)
    hw_tile_max = max(LANE, _round_down(scale_budget // (4 * C_pad * dt_size), LANE))
    if HW <= hw_tile_max:
        hw_tile = HW                     # single full-extent tile (rule-exempt)
    else:
        hw_tile = hw_tile_max            # 128-multiple; tail tile masked in-kernel
    n_hw = _cdiv(HW, hw_tile)
    tile_bytes = C_pad * _round_up(hw_tile, LANE) * dt_size

    # Phase A: pooled sums only (weight stays OUT of kernel VMEM).
    cost_pool = pl.CostEstimate(
        flops=int(2 * B * C * HW),
        transcendentals=0,
        bytes_accessed=int(B * C * HW * dt_size + B * C * 4),
    )
    sums = pl.pallas_call(
        functools.partial(_fe_pool_kernel, hw=HW),
        out_shape=jax.ShapeDtypeStruct((B, C, 1), jnp.float32),
        grid_spec=pltpu.PrefetchScalarGridSpec(
            num_scalar_prefetch=0,
            grid=(B, n_hw),
            in_specs=[pl.BlockSpec((1, C, hw_tile), lambda b, t: (b, 0, t))],
            out_specs=pl.BlockSpec((1, C, 1), lambda b, t: (b, 0, 0)),
        ),
        compiler_params=pltpu.CompilerParams(
            dimension_semantics=("parallel", "arbitrary"),
            vmem_limit_bytes=_vmem_limit(2 * tile_bytes),
        ),
        cost_estimate=cost_pool,
    )(x_flat)

    # Tiny (B,C)x(C,C) gate matmul + sigmoid in plain XLA (negligible cost,
    # keeps the weight out of VMEM entirely — critical on v7x).
    pooled = sums[:, :, 0] * inv_hw                              # (B, C) f32
    gate = jax.nn.sigmoid(
        jnp.dot(pooled.astype(wt.dtype), wt,
                preferred_element_type=jnp.float32))             # (B, C) f32
    gates = gate[:, :, None]                                     # (B, C, 1) f32

    # Phase B: bandwidth-bound lane-dense scale (no weight, no MXU).
    cost_scale = pl.CostEstimate(
        flops=int(B * C * HW),
        transcendentals=0,
        bytes_accessed=int(2 * B * C * HW * dt_size + B * C * 4),
    )
    out_flat = pl.pallas_call(
        _fe_scale_kernel,
        out_shape=jax.ShapeDtypeStruct((B, C, HW), x.dtype),
        grid_spec=pltpu.PrefetchScalarGridSpec(
            num_scalar_prefetch=0,
            grid=(B, n_hw),
            in_specs=[
                pl.BlockSpec((1, C, hw_tile), lambda b, t: (b, 0, t)),
                pl.BlockSpec((1, C, 1), lambda b, t: (b, 0, 0)),
            ],
            out_specs=pl.BlockSpec((1, C, hw_tile), lambda b, t: (b, 0, t)),
        ),
        compiler_params=pltpu.CompilerParams(
            dimension_semantics=("parallel", "parallel"),
            vmem_limit_bytes=_vmem_limit(4 * tile_bytes),
        ),
        cost_estimate=cost_scale,
    )(x_flat, gates)
    return out_flat.reshape(B, C, H, W)


def reference(x, w):
    pooled = jnp.mean(x, axis=(2, 3))                            # (B, C)
    gate = jax.nn.sigmoid(pooled @ w.T)                          # (B, C)
    return gate[:, :, None, None] * x


if __name__ == "__main__":
    key = jax.random.PRNGKey(0)
    kx, kw, kx2 = jax.random.split(key, 3)

    B, C, H, W = 2, 4, 16, 16
    x = jax.random.normal(kx, (B, C, H, W), dtype=jnp.float32)
    # Deterministic weight mimicking nn.Linear's uniform(-1/sqrt(C), 1/sqrt(C)).
    bound = 1.0 / jnp.sqrt(jnp.float32(C))
    w = jax.random.uniform(kw, (C, C), dtype=jnp.float32,
                           minval=-bound, maxval=bound)

    ref = reference(x, w)
    out = jax.block_until_ready(feature_enhancement(x, w))
    assert out.shape == (B, C, H, W)
    assert jnp.allclose(out, ref, atol=1e-5, rtol=1e-5)

    # Non-128-multiple spatial size (7x7): exercises the pad-free masked-tail
    # fused path that replaced the wrapper-level pad/slice copies.
    x2 = jax.random.normal(kx2, (B, C, 7, 7), dtype=jnp.float32)
    ref2 = reference(x2, w)
    out2 = jax.block_until_ready(feature_enhancement(x2, w))
    assert jnp.allclose(out2, ref2, atol=1e-5, rtol=1e-5)

    # Two-phase fallback path (used when C*HW exceeds the fused VMEM budget).
    out3 = jax.block_until_ready(feature_enhancement(x, w, force_two_phase=True))
    assert jnp.allclose(out3, ref, atol=1e-5, rtol=1e-5)
    out4 = jax.block_until_ready(feature_enhancement(x2, w, force_two_phase=True))
    assert jnp.allclose(out4, ref2, atol=1e-5, rtol=1e-5)

    print("KERNEL_OK")
</pallas_src>

<mosaic_0001>
module attributes {stable_mosaic.version = 11 : i64} {
  func.func @_fe_fused_kernel(%arg0: i32, %arg1: memref<1x4x256xf32, #tpu.memory_space<vmem>>, %arg2: memref<4x4xf32, #tpu.memory_space<vmem>>, %arg3: memref<1x4x256xf32, #tpu.memory_space<vmem>>) attributes {dimension_semantics = [#tpu.dimension_semantics<parallel>], iteration_bounds = array<i64: 2>, scalar_prefetch = 0 : i64, scratch_operands = 0 : i64, tpu.core_type = #tpu.core_type<tc>, window_params = [{transform_indices = @transform_0, window_bounds = array<i64: 1, 4, 256>}, {pipeline_mode = #tpu.pipeline_mode<synchronous>, transform_indices = @transform_1, window_bounds = array<i64: 4, 4>}, {transform_indices = @transform_2, window_bounds = array<i64: 1, 4, 256>}]} {
    %c0 = arith.constant 0 : index
    %c0_0 = arith.constant 0 : index
    %c0_1 = arith.constant 0 : index
    %0 = vector.load %arg1[%c0, %c0_0, %c0_1] : memref<1x4x256xf32, #tpu.memory_space<vmem>>, vector<1x4x256xf32>
    %cst = arith.constant dense<0.000000e+00> : vector<1x4xf32>
    %1 = vector.multi_reduction <add>, %0, %cst [2] : vector<1x4x256xf32> to vector<1x4xf32>
    %cst_2 = arith.constant 3.906250e-03 : f32
    %2 = vector.broadcast %cst_2 : f32 to vector<1x4xf32>
    %3 = arith.mulf %1, %2 : vector<1x4xf32>
    %c0_3 = arith.constant 0 : index
    %c0_4 = arith.constant 0 : index
    %4 = vector.load %arg2[%c0_3, %c0_4] : memref<4x4xf32, #tpu.memory_space<vmem>>, vector<4x4xf32>
    %cst_5 = arith.constant dense<0.000000e+00> : vector<1x4xf32>
    %5 = tpu.matmul %3, %4, %cst_5 {dimension_numbers = #tpu.dot_dimension_numbers<[1], [0], [0], [1], [0, 0, 1, 1], [], []>} : vector<1x4xf32>, vector<4x4xf32>, vector<1x4xf32> -> vector<1x4xf32>
    %6 = arith.negf %5 : vector<1x4xf32>
    %7 = math.exp %6 : vector<1x4xf32>
    %cst_6 = arith.constant 1.000000e+00 : f32
    %8 = vector.broadcast %cst_6 : f32 to vector<1x4xf32>
    %9 = arith.addf %8, %7 : vector<1x4xf32>
    %10 = arith.divf %8, %9 : vector<1x4xf32>
    %11 = vector.shape_cast %10 : vector<1x4xf32> to vector<1x4x1xf32>
    %12 = vector.broadcast %11 : vector<1x4x1xf32> to vector<1x4x256xf32>
    %13 = arith.mulf %0, %12 : vector<1x4x256xf32>
    %c0_7 = arith.constant 0 : index
    %c0_8 = arith.constant 0 : index
    %c0_9 = arith.constant 0 : index
    %14 = vector.load %arg3[%c0_7, %c0_8, %c0_9] : memref<1x4x256xf32, #tpu.memory_space<vmem>>, vector<1x4x256xf32>
    tpu.vector_store %arg3[%c0_7, %c0_8, %c0_9], %13 {strides = array<i32>} : memref<1x4x256xf32, #tpu.memory_space<vmem>>, vector<1x4x256xf32>,
    return
  }
  func.func @transform_0(%arg0: i32) -> (i32, i32, i32) {
    %c0_i32 = arith.constant 0 : i32
    %c0_i32_0 = arith.constant 0 : i32
    %c0_i32_1 = arith.constant 0 : i32
    return %arg0, %c0_i32, %c0_i32_0 : i32, i32, i32
  }
  func.func @transform_1(%arg0: i32) -> (i32, i32) {
    %c0_i32 = arith.constant 0 : i32
    %c0_i32_0 = arith.constant 0 : i32
    %c0_i32_1 = arith.constant 0 : i32
    return %c0_i32, %c0_i32_0 : i32, i32
  }
  func.func @transform_2(%arg0: i32) -> (i32, i32, i32) {
    %c0_i32 = arith.constant 0 : i32
    %c0_i32_0 = arith.constant 0 : i32
    %c0_i32_1 = arith.constant 0 : i32
    return %arg0, %c0_i32, %c0_i32_0 : i32, i32, i32
  }
}

</mosaic_0001>

<bundles_post_ra>
// kernel: tpu_custom_call.1
= control target key start
LH: loop header
LB: loop body
LE: loop exit
PB: predicated region body
PF: predicated region fallthrough
CT: control target
= control target key end

     0   :  { %7 = vsyncpa [#allocation3], 0  ;;  %s795_s0 = inlined_call_operand.hbm [shape: f32[2,4,256], index: 0, kind: input, shape index: {}]   ;;  %s796_s1 = inlined_call_operand.hbm [shape: f32[4,4], index: 1, kind: input, shape index: {}]   ;;  %s797_s2 = inlined_call_operand.hbm [shape: f32[2,4,256], index: 2, kind: output, shape index: {}]  }
   0x1   :  { %9 = vsyncpa [#allocation3 + $0x1], 0 }
   0x2   :  { %10 = vsyncpa [#allocation6], 0 }
   0x3   :  { %11 = vsyncpa [#allocation4], 0 }
   0x4   :  { %13 = vsyncpa [#allocation4 + $0x1], 0  ;;  %s625_s9 = smov 0   ;;  %s627_s10 = smov 0  }
   0x5   :  { %s629_s11 = smov 0   ;;  %s631_s12 = smov 0  }
   0x6 LB: > { %s646_s13 = sadd.s32 4294967295, %s602_s12   ;;  %s387_s14 = sadd.s32 4294967294, %s602_s12   ;;  %s602_s12 = sphi %s631_s12, %s820_s12   ;;  %s598_s11 = sphi %s629_s11, %s819_s11   ;;  %s594_s10 = sphi %s627_s10, %s818_s10   ;;  %s590_s9 = sphi %s625_s9, %s817_s9  }
   0x7   : > { %p39_p0 = scmp.ne.s32.totalorder %s594_s10, %s590_s9  ;;  %p798_p1 = scmp.eq.s32.totalorder %s646_s13, 0 }
   0x8   : > { %p90_p3 = scmp.eq.s32.totalorder %s387_s14, 1  ;;  %p388_p5 = scmp.ge.s32.totalorder %s602_s12, 1 }
   0x9   : > { %p655_p4 = por %p798_p1, %p39_p0  ;;  %p97_p7 = scmp.lt.s32.totalorder %s602_s12, 3 }
   0xa   : > { %p660_p6 = por %p90_p3, %p39_p0  ;;  %s604_s18 = smov [#allocation5]  }
   0xb   : > { %s802_s15 = scalar_select %p655_p4, 1, 0 }
   0xc   : > { %s803_s16 = scalar_select %p660_p6, 1, 0 }
   0xd   : > { %p665_p8 = pnand %p388_p5, %p97_p7  ;;  %s110_s19 = sshll.u32 %s604_s18, 4  ;;  %s111_s19 = int_to_ptr.vmem [resolvable:$true] %s110_s19 }
   0xe   : > { %s673_s20 = sadd.s32 1, %s602_s12   ;;  %s26_s24 = sadd.s32 1, %s598_s11 }
   0xf   : > { %s804_s17 = scalar_select %p665_p8, 1, 0 }
  0x10   : > { %p423_p10 = pneg %p665_p8  ;;  %s23_s22 = ssub.s32 %s602_s12, %s673_s20 }
  0x11   : > { %p683_p12 = scmp.eq.s32.totalorder %s23_s22, 0  ;;  %p33_p13 = scmp.ne.s32.totalorder %s598_s11, %s594_s10 }
  0x12   : > { %p677_p11 = pnand %p423_p10, %p798_p1  ;;  %s491_s25 = scalar_lea.vmem %s111_s19, 64 }
  0x13   : > { %p492_p3 = scmp.ne.s32.totalorder %s111_s19, %s491_s25  ;;  %p499_p9 = scmp.lt.s32.totalorder %s111_s19, %s111_s19 }
  0x14   : > { %p482_p0 = pneg %p677_p11  ;;  %p500_p2 = scmp.lt.s32.totalorder %s491_s25, %s491_s25 }
  0x16   : > { %p494_p5 = pnand %p492_p3, %p482_p0  ;;  %p501_p10 = por %p500_p2, %p499_p9 }
  0x18   : > { %p495_p7 = pneg %p494_p5 }
  0x1a   : > { %p502_p1 = pnand %p501_p10, %p495_p7 }
  0x1c   : > { %505 = shalt.err (!%p502_p1)
}
  0x1d   : > { %426 = dma.hbm_to_vmem [thread:$0]  (!%p677_p11), %s796_s1, 64, %s111_s19, [#allocation6]  }
  0x1e   : > { %s700_s28 = scalar_select %p683_p12, %s598_s11, %s26_s24  }
  0x1f   : > { %p34_p1 = scmp.eq.s32.totalorder %s602_s12, 0  ;;  %p807_p2 = scmp.eq.s32.totalorder %s646_s13, 1 }
  0x20   : > { %p436_p0 = scmp.lt.s32.totalorder %s602_s12, 2  ;;  %s121_s30 = sand.u32 1, %s598_s11  }
  0x21   : > { %p708_p9 = por %p807_p2, %p33_p13  ;;  %p35_p3 = por %p34_p1, %p33_p13 }
  0x22   : > { %s391_s3 = sshll.u32 %s121_s30, 3  ;;  %s406_s4 = sshll.u32 %s602_s12, 7 }
  0x23   : > { %s808_s29 = scalar_select %p708_p9, 1, 0 }
  0x24   : > { %s721_s7 = scalar_lea.hbm %s795_s0, %s406_s4  ;;  %s125_s8 = scalar_lea.vmem [#allocation2], %s391_s3 }
  0x25   : > { %s133_s14 = sshll.u32 %s125_s8, 4  ;;  %p723_p11 = pnand %p436_p0, %p35_p3  ;;  %s134_s14 = int_to_ptr.vmem [resolvable:$true] %s133_s14 }
  0x26   : > { %s122_s19 = scalar_lea.sflag [#allocation3], %s121_s30  ;;  %s506_s21 = scalar_lea.hbm %s721_s7, 128 }
  0x27   : > { %p507_p12 = scmp.ne.s32.totalorder %s721_s7, %s506_s21  ;;  %p508_p13 = pneg %p723_p11 }
  0x28   : > { %s511_s24 = scalar_lea.hbm %s795_s0, 256  ;;  %p512_p10 = scmp.lt.s32.totalorder %s721_s7, %s795_s0 }
  0x29   : > { %p509_p5 = pnand %p508_p13, %p507_p12  ;;  %p513_p1 = scmp.lt.s32.totalorder %s511_s24, %s506_s21 }
  0x2b   : > { %p510_p7 = pneg %p509_p5  ;;  %p514_p2 = por %p513_p1, %p512_p10 }
  0x2d   : > { %p515_p0 = pnand %p514_p2, %p510_p7 }
  0x2f   : > { %518 = shalt.err (!%p515_p0)
}
  0x30   : > { %s519_s27 = scalar_lea.vmem %s134_s14, 128  ;;  %s605_s30 = smov [#allocation2]  }
  0x31   : > { %p520_p3 = scmp.ne.s32.totalorder %s134_s14, %s519_s27  ;;  %s524_s3 = sshll.u32 %s605_s30, 4  ;;  %s525_s3 = int_to_ptr.vmem [resolvable:$false] %s524_s3 }
  0x32   : > { %s526_s4 = scalar_lea.vmem %s525_s3, 256  ;;  %p527_p12 = scmp.lt.s32.totalorder %s134_s14, %s525_s3 }
  0x33   : > { %p522_p6 = pnand %p520_p3, %p508_p13  ;;  %p528_p5 = scmp.lt.s32.totalorder %s526_s4, %s519_s27 }
  0x35   : > { %p523_p9 = pneg %p522_p6  ;;  %p529_p4 = por %p528_p5, %p527_p12 }
  0x37   : > { %p530_p8 = pnand %p529_p4, %p523_p9 }
  0x39   : > { %533 = shalt.err (!%p530_p8)
}
  0x3a   : > { %430 = dma.hbm_to_vmem [thread:$0]  (!%p723_p11), %s721_s7, 128, %s134_s14, %s122_s19  }
  0x3b   : > { %p810_p7 = scmp.ne.s32.totalorder %s804_s17, 0 }
  0x3c   : > { %s744_s5 = sand.u32 (!%p810_p7), 1, %s594_s10   ;;  %p811_p4 = scmp.ne.s32.totalorder (!%p810_p7), %s802_s15, 0 }
  0x3d   : > { %142 = sbr.rel (%p810_p7) target bundleno = 577 (0x241), region = 28  ;;  %s395_s6 = sshll.u32 (!%p810_p7), %s744_s5, 3 }
  0x3e   : > { %s145_s8 = scalar_lea.sflag (!%p810_p7), [#allocation3], %s744_s5  ;;  %s148_s21 = scalar_lea.vmem (!%p810_p7), [#allocation2], %s395_s6 }
  0x42   : > { %577 = dma.done.wait (%p811_p4), %s145_s8, 128  }
  0x43   : > { %579 = vsyncadd (%p811_p4), %s145_s8, 4294967168  ;;  %p812_p6 = scmp.eq.s32.totalorder %s646_s13, 0 }
  0x45   : > { %581 = dma.done.wait (%p812_p6), [#allocation6], 64   ;;  %p813_p8 = pmov %p812_p6 }
  0x46   : > { %vm177_vm0 = vcmask 1043456   ;;  %v173_v0 = vld [vmem:[%s148_s21] sm:$0xff]  ;;  %v606_v5 = vmov 0.0   ;;  %v184_v6 = vld [vmem:[#allocation5] sm:$0xf]  ;;  %vm607_vm1 = vmmov 0   ;;  %v186_v7 = vlaneseq }
  0x47   : > { %583 = vsyncadd (%p813_p8), [#allocation6], 4294967232  ;;  %v175_v1 = vcombine.high %v173_v0, %v173_v0  ;;  %v178_v2 = vsel %vm177_vm0, %v173_v0, 0.0  ;;  %410 = vmatprep.subr.mxu0 %v606_v5  ;;  %412 = vmatprep.mubr.msk.f32.mxu0 %vm607_vm1, %v606_v5  ;;  %vm192_vm2 = vcmask 31744   ;;  %v608_v22 = vmov 839922192  }
  0x48   : > { %411 = vmatpush3.msk.msra.mxu0 %vm177_vm0, %v184_v6  ;;  %v187_v8 = vand.u32 127, %v186_v7  ;;  %v189_v9 = vshrl.u32 %v186_v7, 7  ;;  %v283_v23 = vunpack.c.l.s4 %v608_v22  ;;  %s407_s15 = sshll.u32 %s646_s13, 7  ;;  %s172_s17 = scalar_lea.vmem [#allocation7], %s395_s6 }
  0x49   : > { %v179_v3 = vsel %vm177_vm0, %v175_v1, 0.0  ;;  %s307_s7 = sshll.u32 %s172_s17, 4  ;;  %s305_s19 = scalar_lea.hbm %s797_s2, %s407_s15  ;;  %s308_s7 = int_to_ptr.vmem [resolvable:$true] %s307_s7 }
  0x4a   : > { %v180_v4 = vadd.f32 %v179_v3, %v178_v2  ;;  %v190_v10 = vsub.s32 %v187_v8, %v189_v9  ;;  %v276_v19 = vsub.s32 0, %v189_v9  ;;  %v284_v24 = vunpack.c.0.s8 %v283_v23  ;;  %s293_s22 = scalar_lea.sflag [#allocation4], %s744_s5  ;;  %s534_s23 = scalar_lea.vmem %s308_s7, 128 }
  0x4b   : > { %p535_p9 = scmp.ne.s32.totalorder %s308_s7, %s534_s23  ;;  %p814_p11 = scmp.ne.s32.totalorder %s808_s29, 0 }
  0x4c   : > { %181 = vadd.xlane.f32.xlu0 %v180_v4  ;;  %v287_v25 = vsub.s32 %v284_v24, %v189_v9  ;;  %s609_s24 = smov [#allocation7]  }
  0x4d   : > { %p536_p13 = pnand %p535_p9, %p814_p11  ;;  %s538_s25 = sshll.u32 %s609_s24, 4  ;;  %s539_s25 = int_to_ptr.vmem [resolvable:$false] %s538_s25 }
  0x4e   : > { %s540_s13 = scalar_lea.vmem %s539_s25, 256  ;;  %p541_p1 = scmp.lt.s32.totalorder %s308_s7, %s539_s25 }
  0x4f   : > { %p537_p10 = pneg %p536_p13  ;;  %p542_p2 = scmp.lt.s32.totalorder %s540_s13, %s534_s23 }
  0x51   : > { %p543_p0 = por %p542_p2, %p541_p1 }
  0x53   : > { %p544_p3 = pnand %p543_p0, %p537_p10 }
  0xd5   : > { %v182_v11 = vpop.xlane.xlu0 %181 }
  0xd6   : > { %v183_v12 = vmul.f32 0.00390625, %v182_v11 }
  0xd8   : > { %v191_v13 = vrot.slane %v183_v12, %v190_v10 }
  0xda   : > { %413 = vmatmul.mubr.msk.f32.vlgmr.msra.gmra.mxu0 %vm192_vm2, %v191_v13 }
 0x19a   : > { %v264_v14 = vpop.f32.mrf.mxu0 }
 0x19b   : > { %v400_v15 = vmul.f32 -1.442695, %v264_v14 }
 0x19c   : > { %v414_v16 = vpop.f32.mrf.mxu0 }
 0x19d   : > { %476 = vpow2.f32 %v400_v15 }
 0x1aa   : > { %v477_v17 = vpop.eup %476 }
 0x1ab   : > { %v271_v18 = vadd.f32 1.0, %v477_v17 }
 0x1ad   : > { %478 = vrcp.f32 %v271_v18 }
 0x1ba   : > { %v479_v20 = vpop.eup %478 }
 0x1bb   : > { %v277_v21 = vrot.slane %v479_v20, %v276_v19 }
 0x1bd   : > { %279 = vbcast.lane.b32.xlu0 %v277_v21, 256 }
 0x22f   : > { %v280_v26 = vpop.permute.xlu0 %279 }
 0x230   : > { %v288_v27 = vrot.slane %v280_v26, %v287_v25 }
 0x232   : > { %v290_v28 = vmul.f32 %v288_v27, %v173_v0 }
 0x234   : > { %291 = vst [vmem:[%s172_s17] sm:$0xff] %v290_v28 }
 0x235   : > { %547 = shalt.err (!%p544_p3)
}
 0x236   : > { %s548_s26 = scalar_lea.hbm %s305_s19, 128  ;;  %s552_s3 = scalar_lea.hbm %s797_s2, 256 }
 0x237   : > { %p549_p12 = scmp.ne.s32.totalorder %s305_s19, %s548_s26  ;;  %p553_p4 = scmp.lt.s32.totalorder %s305_s19, %s797_s2 }
 0x238   : > { %p554_p6 = scmp.lt.s32.totalorder %s552_s3, %s548_s26 }
 0x239   : > { %p550_p5 = pnand %p549_p12, %p814_p11 }
 0x23a   : > { %p555_p8 = por %p554_p6, %p553_p4 }
 0x23b   : > { %p551_p7 = pneg %p550_p5 }
 0x23d   : > { %p556_p9 = pnand %p555_p8, %p551_p7 }
 0x23f   : > { %559 = shalt.err (!%p556_p9)
}
 0x240   : > { %421 = dma.vmem_to_hbm [thread:$0]  (%p814_p11), %s308_s7, 128, %s305_s19, %s293_s22  }
 0x241 PF: > { %s319_s6 = sand.u32 1, %s590_s9   ;;  %p815_p13 = scmp.ne.s32.totalorder %s803_s16, 0 }
 0x242   : > { %p816_p10 = scmp.ge.s32.totalorder %s602_s12, 2  ;;  %s320_s8 = scalar_lea.sflag [#allocation4], %s319_s6 }
 0x244   : > { %p432_p1 = pnand %p816_p10, %p815_p13 }
 0x246   : > { %p433_p2 = pneg %p432_p1 }
 0x248   : > { %585 = dma.done.wait (%p433_p2), %s320_s8, 128  }
 0x249   : > { %587 = vsyncadd (%p433_p2), %s320_s8, 4294967168  ;;  %p16_p0 = scmp.ge.s32.totalorder %s673_s20, 4   ;;  %s817_s9 = smov %s594_s10 }
 0x24a   : > { %s818_s10 = smov %s598_s11  ;;  %s819_s11 = smov %s700_s28 }
 0x24b   : > { %s820_s12 = smov %s673_s20  ;;  %18 = sbr.rel (!%p16_p0) target bundleno = 6 (0x6), region = 77 }
 0x250   :  { %325 = vsyncpa [#allocation3], 1 }
 0x251   :  { %327 = vsyncpa [#allocation3 + $0x1], 1 }
 0x252   :  { %328 = vsyncpa [#allocation6], 1 }
 0x253   :  { %329 = vsyncpa [#allocation4], 1 }
 0x254   :  { %331 = vsyncpa [#allocation4 + $0x1], 1 }

</bundles_post_ra>
